<compile_context>
chip_gen: v7x
topology: tpu7x:2x2x1
jax: 0.10.0
libtpu: 0.0.40
codegen_flags: <defaults>
</compile_context>

<pallas_src>
import jax
import jax.numpy as jnp
from jax.experimental import pallas as pl
from jax.experimental.pallas import tpu as pltpu

NEG_SLOPE = 0.01            # torch.nn.LeakyReLU default
D_IN, D_H, D_OUT = 784, 200, 10
D_H_PAD = 256               # hidden dim padded to a lane multiple (2 x 128)
D_OUT_PAD = 128             # lane-dense padded output width
SUBLANE = 16                # bf16 packing granularity for batch tiles
DEFAULT_TILE_B = 1024       # ~12 MiB per-step footprint incl. temps
VMEM_LIMIT_BYTES = 32 * 1024 * 1024


def _round_up(x, m):
    return ((x + m - 1) // m) * m


def _leaky_relu(x):
    # For 0 < slope < 1, max(x, slope*x) == LeakyReLU(x): 2 VPU ops (mul+max).
    return jnp.maximum(x, NEG_SLOPE * x)


def mlp_kernel(x_ref, w1_ref, b1_ref, w2_ref, b2_ref, w3_ref, b3_ref, o_ref):
    # x arrives in its source dtype (f32 here); cast to bf16 for the MXU inside
    # the kernel instead of a separate wrapper-side astype pass through HBM.
    x = x_ref[...].astype(jnp.bfloat16)                        # (TILE_B, 784)

    # Layer 1: bf16 MXU matmul, f32 accumulation, bf16 bias+LeakyReLU epilogue.
    h1 = jnp.dot(x, w1_ref[...],
                 preferred_element_type=jnp.float32).astype(jnp.bfloat16)
    h1 = _leaky_relu(h1 + b1_ref[...])                         # (TILE_B, 256) bf16

    # Layer 2.
    h2 = jnp.dot(h1, w2_ref[...],
                 preferred_element_type=jnp.float32).astype(jnp.bfloat16)
    h2 = _leaky_relu(h2 + b2_ref[...])                         # (TILE_B, 256) bf16

    # Layer 3: tiny (128-lane) f32 epilogue, store bf16 lane-dense.
    h3 = jnp.dot(h2, w3_ref[...], preferred_element_type=jnp.float32)
    o_ref[...] = _leaky_relu(h3 + b3_ref[...]).astype(o_ref.dtype)


def mlp_forward(x, w1, b1, w2, b2, w3, b3, *, tile_b=DEFAULT_TILE_B):
    """x: (B, 784) float; weights in (in_features, out_features) layout."""
    B = x.shape[0]
    assert x.shape[1] == D_IN

    # --- weight prep: zero-pad hidden 200->256, output 10->128 --------------
    # Padded hidden units get zero weights/bias -> activation leaky(0) = 0, and
    # the matching padded rows of the next layer are zero, so results are exact.
    w1p = jnp.zeros((D_IN, D_H_PAD), jnp.bfloat16).at[:, :D_H].set(
        w1.astype(jnp.bfloat16))
    b1p = jnp.zeros((1, D_H_PAD), jnp.bfloat16).at[:, :D_H].set(
        b1.reshape(1, -1).astype(jnp.bfloat16))
    w2p = jnp.zeros((D_H_PAD, D_H_PAD), jnp.bfloat16).at[:D_H, :D_H].set(
        w2.astype(jnp.bfloat16))
    b2p = jnp.zeros((1, D_H_PAD), jnp.bfloat16).at[:, :D_H].set(
        b2.reshape(1, -1).astype(jnp.bfloat16))
    w3p = jnp.zeros((D_H_PAD, D_OUT_PAD), jnp.bfloat16).at[:D_H, :D_OUT].set(
        w3.astype(jnp.bfloat16))
    b3p = jnp.zeros((1, D_OUT_PAD), jnp.float32).at[:, :D_OUT].set(
        b3.reshape(1, -1).astype(jnp.float32))
    # TODO(synk): for a fixed-weight serving loop, keep weights resident across
    # calls (cross-pallas_call prefetch); on v5e/v6e int8 weights (MXU int path)
    # would ~2x layers 1-2 if quality allows (not applicable on fp8-only v7x).

    # --- batch tiling --------------------------------------------------------
    # Tile is a multiple of 16 (bf16 sublane packing) and capped so the
    # "parallel" grid has >= 2 steps (keeps both v7x TCs busy). No jnp.pad:
    # the ragged last block uses Pallas' masked edge reads/writes.
    tile_b = max(SUBLANE, min(tile_b, _round_up(pl.cdiv(B, 2), SUBLANE)))
    grid = (pl.cdiv(B, tile_b),)

    resident = lambda i: (0, 0)  # same block index every step -> stays in VMEM
    # NOTE: pipeline_mode=pl.Buffered(1) on the resident specs would drop the
    # duplicated ~0.5 MiB weight buffers (minor); omitted for portable lowering.

    flops = 2 * B * (D_IN * D_H_PAD + D_H_PAD * D_H_PAD + D_H_PAD * D_OUT_PAD)
    bytes_accessed = (
        x.size * x.dtype.itemsize
        + (w1p.size + w2p.size + w3p.size + b1p.size + b2p.size) * 2
        + b3p.size * 4
        + B * D_OUT_PAD * 2)

    out = pl.pallas_call(
        mlp_kernel,
        out_shape=jax.ShapeDtypeStruct((B, D_OUT_PAD), jnp.bfloat16),
        grid_spec=pltpu.PrefetchScalarGridSpec(
            num_scalar_prefetch=0,
            grid=grid,
            in_specs=[
                pl.BlockSpec((tile_b, D_IN), lambda i: (i, 0)),   # x tile
                pl.BlockSpec((D_IN, D_H_PAD), resident),          # w1
                pl.BlockSpec((1, D_H_PAD), resident),             # b1
                pl.BlockSpec((D_H_PAD, D_H_PAD), resident),       # w2
                pl.BlockSpec((1, D_H_PAD), resident),             # b2
                pl.BlockSpec((D_H_PAD, D_OUT_PAD), resident),     # w3
                pl.BlockSpec((1, D_OUT_PAD), resident),           # b3
            ],
            out_specs=pl.BlockSpec((tile_b, D_OUT_PAD), lambda i: (i, 0)),
        ),
        compiler_params=pltpu.CompilerParams(
            dimension_semantics=("parallel",),
            vmem_limit_bytes=VMEM_LIMIT_BYTES,
        ),
        cost_estimate=pl.CostEstimate(
            flops=flops, transcendentals=0, bytes_accessed=bytes_accessed),
    )(x, w1p, b1p, w2p, b2p, w3p, b3p)

    # Drop the zero lane padding; return f32 like the original module.
    return out[:, :D_OUT].astype(jnp.float32)


def init_params(key):
    """torch.nn.Linear default init: U(+/- 1/sqrt(fan_in)) for W and b."""
    dims = [(D_IN, D_H), (D_H, D_H), (D_H, D_OUT)]
    params = []
    for i, (fan_in, fan_out) in enumerate(dims):
        kw, kb = jax.random.split(jax.random.fold_in(key, i))
        bound = 1.0 / (fan_in ** 0.5)
        w = jax.random.uniform(kw, (fan_in, fan_out), jnp.float32, -bound, bound)
        b = jax.random.uniform(kb, (1, fan_out), jnp.float32, -bound, bound)
        params += [w, b]
    return params


def mlp_reference(x, w1, b1, w2, b2, w3, b3):
    # Mirrors the kernel's bf16 quantization of the matmul operands (f32
    # accumulation); the kernel's bf16 epilogue/output adds only ~0.4% extra
    # rounding, well inside the test tolerance.
    def lin(h, w, b):
        hf = h.astype(jnp.bfloat16).astype(jnp.float32)
        wf = w.astype(jnp.bfloat16).astype(jnp.float32)
        return _leaky_relu(hf @ wf + b)
    h = lin(x, w1, b1)
    h = lin(h, w2, b2)
    return lin(h, w3, b3)


if __name__ == "__main__":
    key = jax.random.PRNGKey(0)
    kx, kp = jax.random.split(key)

    # Small demo batch: the tile cap gives tile_b=16 -> a 2-step "parallel"
    # grid with a ragged last block (24 = 16 + 8), exercising the masked-edge
    # path that replaced the old jnp.pad.
    B = 24
    x = jax.random.normal(kx, (B, D_IN), dtype=jnp.float32)
    w1, b1, w2, b2, w3, b3 = init_params(kp)

    out = mlp_forward(x, w1, b1, w2, b2, w3, b3)
    out = jax.block_until_ready(out)

    ref = mlp_reference(x, w1, b1, w2, b2, w3, b3)
    assert out.shape == (B, D_OUT), out.shape
    assert out.dtype == jnp.float32, out.dtype
    assert jnp.allclose(out, ref, atol=2e-2, rtol=2e-2), "mismatch vs reference"

    print("KERNEL_OK")
</pallas_src>

<mosaic_0001>
module attributes {stable_mosaic.version = 11 : i64} {
  func.func @mlp_kernel(%arg0: i32, %arg1: memref<16x784xf32, #tpu.memory_space<vmem>>, %arg2: memref<784x256xbf16, #tpu.memory_space<vmem>>, %arg3: memref<1x256xbf16, #tpu.memory_space<vmem>>, %arg4: memref<256x256xbf16, #tpu.memory_space<vmem>>, %arg5: memref<1x256xbf16, #tpu.memory_space<vmem>>, %arg6: memref<256x128xbf16, #tpu.memory_space<vmem>>, %arg7: memref<1x128xf32, #tpu.memory_space<vmem>>, %arg8: memref<16x128xbf16, #tpu.memory_space<vmem>>) attributes {dimension_semantics = [#tpu.dimension_semantics<parallel>], iteration_bounds = array<i64: 2>, scalar_prefetch = 0 : i64, scratch_operands = 0 : i64, tpu.core_type = #tpu.core_type<tc>, window_params = [{transform_indices = @transform_0, window_bounds = array<i64: 16, 784>}, {pipeline_mode = #tpu.pipeline_mode<synchronous>, transform_indices = @transform_1, window_bounds = array<i64: 784, 256>}, {pipeline_mode = #tpu.pipeline_mode<synchronous>, transform_indices = @transform_2, window_bounds = array<i64: 1, 256>}, {pipeline_mode = #tpu.pipeline_mode<synchronous>, transform_indices = @transform_3, window_bounds = array<i64: 256, 256>}, {pipeline_mode = #tpu.pipeline_mode<synchronous>, transform_indices = @transform_4, window_bounds = array<i64: 1, 256>}, {pipeline_mode = #tpu.pipeline_mode<synchronous>, transform_indices = @transform_5, window_bounds = array<i64: 256, 128>}, {pipeline_mode = #tpu.pipeline_mode<synchronous>, transform_indices = @transform_6, window_bounds = array<i64: 1, 128>}, {transform_indices = @transform_7, window_bounds = array<i64: 16, 128>}]} {
    %c0 = arith.constant 0 : index
    %c0_0 = arith.constant 0 : index
    %0 = vector.load %arg1[%c0, %c0_0] : memref<16x784xf32, #tpu.memory_space<vmem>>, vector<16x784xf32>
    %1 = arith.truncf %0 : vector<16x784xf32> to vector<16x784xbf16>
    %c0_1 = arith.constant 0 : index
    %c0_2 = arith.constant 0 : index
    %2 = vector.load %arg2[%c0_1, %c0_2] : memref<784x256xbf16, #tpu.memory_space<vmem>>, vector<784x256xbf16>
    %cst = arith.constant dense<0.000000e+00> : vector<16x256xf32>
    %3 = tpu.matmul %1, %2, %cst {dimension_numbers = #tpu.dot_dimension_numbers<[1], [0], [0], [1], [0, 0, 1, 1], [], []>} : vector<16x784xbf16>, vector<784x256xbf16>, vector<16x256xf32> -> vector<16x256xf32>
    %4 = arith.truncf %3 : vector<16x256xf32> to vector<16x256xbf16>
    %c0_3 = arith.constant 0 : index
    %c0_4 = arith.constant 0 : index
    %5 = vector.load %arg3[%c0_3, %c0_4] : memref<1x256xbf16, #tpu.memory_space<vmem>>, vector<1x256xbf16>
    %6 = vector.broadcast %5 : vector<1x256xbf16> to vector<16x256xbf16>
    %7 = arith.addf %4, %6 : vector<16x256xbf16>
    %cst_5 = arith.constant 1.000980e-02 : bf16
    %8 = vector.broadcast %cst_5 : bf16 to vector<16x256xbf16>
    %9 = arith.mulf %8, %7 : vector<16x256xbf16>
    %10 = arith.maximumf %7, %9 : vector<16x256xbf16>
    %c0_6 = arith.constant 0 : index
    %c0_7 = arith.constant 0 : index
    %11 = vector.load %arg4[%c0_6, %c0_7] : memref<256x256xbf16, #tpu.memory_space<vmem>>, vector<256x256xbf16>
    %cst_8 = arith.constant dense<0.000000e+00> : vector<16x256xf32>
    %12 = tpu.matmul %10, %11, %cst_8 {dimension_numbers = #tpu.dot_dimension_numbers<[1], [0], [0], [1], [0, 0, 1, 1], [], []>} : vector<16x256xbf16>, vector<256x256xbf16>, vector<16x256xf32> -> vector<16x256xf32>
    %13 = arith.truncf %12 : vector<16x256xf32> to vector<16x256xbf16>
    %c0_9 = arith.constant 0 : index
    %c0_10 = arith.constant 0 : index
    %14 = vector.load %arg5[%c0_9, %c0_10] : memref<1x256xbf16, #tpu.memory_space<vmem>>, vector<1x256xbf16>
    %15 = vector.broadcast %14 : vector<1x256xbf16> to vector<16x256xbf16>
    %16 = arith.addf %13, %15 : vector<16x256xbf16>
    %cst_11 = arith.constant 1.000980e-02 : bf16
    %17 = vector.broadcast %cst_11 : bf16 to vector<16x256xbf16>
    %18 = arith.mulf %17, %16 : vector<16x256xbf16>
    %19 = arith.maximumf %16, %18 : vector<16x256xbf16>
    %c0_12 = arith.constant 0 : index
    %c0_13 = arith.constant 0 : index
    %20 = vector.load %arg6[%c0_12, %c0_13] : memref<256x128xbf16, #tpu.memory_space<vmem>>, vector<256x128xbf16>
    %cst_14 = arith.constant dense<0.000000e+00> : vector<16x128xf32>
    %21 = tpu.matmul %19, %20, %cst_14 {dimension_numbers = #tpu.dot_dimension_numbers<[1], [0], [0], [1], [0, 0, 1, 1], [], []>} : vector<16x256xbf16>, vector<256x128xbf16>, vector<16x128xf32> -> vector<16x128xf32>
    %c0_15 = arith.constant 0 : index
    %c0_16 = arith.constant 0 : index
    %22 = vector.load %arg7[%c0_15, %c0_16] : memref<1x128xf32, #tpu.memory_space<vmem>>, vector<1x128xf32>
    %23 = vector.broadcast %22 : vector<1x128xf32> to vector<16x128xf32>
    %24 = arith.addf %21, %23 : vector<16x128xf32>
    %cst_17 = arith.constant 0.00999999977 : f32
    %25 = vector.broadcast %cst_17 : f32 to vector<16x128xf32>
    %26 = arith.mulf %25, %24 : vector<16x128xf32>
    %27 = arith.maximumf %24, %26 : vector<16x128xf32>
    %28 = arith.truncf %27 : vector<16x128xf32> to vector<16x128xbf16>
    %c0_18 = arith.constant 0 : index
    %c0_19 = arith.constant 0 : index
    %29 = vector.load %arg8[%c0_18, %c0_19] : memref<16x128xbf16, #tpu.memory_space<vmem>>, vector<16x128xbf16>
    tpu.vector_store %arg8[%c0_18, %c0_19], %28 {strides = array<i32>} : memref<16x128xbf16, #tpu.memory_space<vmem>>, vector<16x128xbf16>,
    return
  }
  func.func @transform_0(%arg0: i32) -> (i32, i32) {
    %c0_i32 = arith.constant 0 : i32
    %c0_i32_0 = arith.constant 0 : i32
    return %arg0, %c0_i32 : i32, i32
  }
  func.func @transform_1(%arg0: i32) -> (i32, i32) {
    %c0_i32 = arith.constant 0 : i32
    %c0_i32_0 = arith.constant 0 : i32
    %c0_i32_1 = arith.constant 0 : i32
    return %c0_i32, %c0_i32_0 : i32, i32
  }
  func.func @transform_2(%arg0: i32) -> (i32, i32) {
    %c0_i32 = arith.constant 0 : i32
    %c0_i32_0 = arith.constant 0 : i32
    %c0_i32_1 = arith.constant 0 : i32
    return %c0_i32, %c0_i32_0 : i32, i32
  }
  func.func @transform_3(%arg0: i32) -> (i32, i32) {
    %c0_i32 = arith.constant 0 : i32
    %c0_i32_0 = arith.constant 0 : i32
    %c0_i32_1 = arith.constant 0 : i32
    return %c0_i32, %c0_i32_0 : i32, i32
  }
  func.func @transform_4(%arg0: i32) -> (i32, i32) {
    %c0_i32 = arith.constant 0 : i32
    %c0_i32_0 = arith.constant 0 : i32
    %c0_i32_1 = arith.constant 0 : i32
    return %c0_i32, %c0_i32_0 : i32, i32
  }
  func.func @transform_5(%arg0: i32) -> (i32, i32) {
    %c0_i32 = arith.constant 0 : i32
    %c0_i32_0 = arith.constant 0 : i32
    %c0_i32_1 = arith.constant 0 : i32
    return %c0_i32, %c0_i32_0 : i32, i32
  }
  func.func @transform_6(%arg0: i32) -> (i32, i32) {
    %c0_i32 = arith.constant 0 : i32
    %c0_i32_0 = arith.constant 0 : i32
    %c0_i32_1 = arith.constant 0 : i32
    return %c0_i32, %c0_i32_0 : i32, i32
  }
  func.func @transform_7(%arg0: i32) -> (i32, i32) {
    %c0_i32 = arith.constant 0 : i32
    %c0_i32_0 = arith.constant 0 : i32
    return %arg0, %c0_i32 : i32, i32
  }
}

</mosaic_0001>

<bundles_post_ra>
// kernel: tpu_custom_call.1
= control target key start
LH: loop header
LB: loop body
LE: loop exit
PB: predicated region body
PF: predicated region fallthrough
CT: control target
= control target key end

     0   :  { %s2837_s0 = inlined_call_operand.hbm [shape: f32[24,784], index: 0, kind: input, shape index: {}]   ;;  %s2838_s1 = inlined_call_operand.hbm [shape: bf16[784,256], index: 1, kind: input, shape index: {}]   ;;  %s2839_s2 = inlined_call_operand.vmem [shape: bf16[1,256], index: 2, kind: input, shape index: {}]   ;;  %s2840_s3 = inlined_call_operand.hbm [shape: bf16[256,256], index: 3, kind: input, shape index: {}]   ;;  %s2841_s4 = inlined_call_operand.vmem [shape: bf16[1,256], index: 4, kind: input, shape index: {}]   ;;  %s2842_s5 = inlined_call_operand.hbm [shape: bf16[256,128], index: 5, kind: input, shape index: {}]   ;;  %s2843_s6 = inlined_call_operand.vmem [shape: f32[1,128], index: 6, kind: input, shape index: {}]   ;;  %s2844_s7 = inlined_call_operand.hbm [shape: bf16[24,128], index: 7, kind: output, shape index: {}]  }
   0x1   :  { %2852 = sst [smem:[#allocation19_spill]] %s2838_s1 }
   0x2   :  { %12 = vsyncpa [#allocation3], 0 }
   0x3   :  { %14 = vsyncpa [#allocation3 + $0x1], 0 }
   0x4   :  { %15 = vsyncpa [#allocation6], 0 }
   0x5   :  { %16 = vsyncpa [#allocation9], 0 }
   0x6   :  { %17 = vsyncpa [#allocation4], 0 }
   0x7   :  { %19 = vsyncpa [#allocation4 + $0x1], 0  ;;  %s2544_s24 = smov 0   ;;  %s2546_s25 = smov 0  }
   0x8   :  { %s2548_s26 = smov 0   ;;  %s2550_s27 = smov 0  }
   0x9 LB: > { %2853 = sst [smem:[#allocation15_spill]] %s2475_s24  ;;  %s2565_s28 = sadd.s32 4294967295, %s2487_s27   ;;  %s2487_s27 = sphi %s2550_s27, %s2876_s27   ;;  %s2483_s26 = sphi %s2548_s26, %s2880_s26   ;;  %s2479_s25 = sphi %s2546_s25, %s2879_s25   ;;  %s2475_s24 = sphi %s2544_s24, %s2878_s24  }
   0xa   : > { %s1786_s29 = sadd.s32 4294967294, %s2487_s27   ;;  %s2569_s30 = sadd.s32 1, %s2487_s27  }
   0xb   : > { %2854 = sst [smem:[#allocation16_spill]] %s2569_s30  ;;  %s32_s8 = sadd.s32 1, %s2483_s26 }
   0xc   : > { %s29_s9 = ssub.s32 %s2487_s27, %s2569_s30  ;;  %p39_p0 = scmp.ne.s32.totalorder %s2483_s26, %s2479_s25 }
   0xd   : > { %p30_p1 = scmp.eq.s32.totalorder %s29_s9, 0  ;;  %p40_p2 = scmp.eq.s32.totalorder %s2487_s27, 0 }
   0xe   : > { %p45_p3 = scmp.ne.s32.totalorder %s2479_s25, %s2475_s24  ;;  %p2845_p4 = scmp.eq.s32.totalorder %s2565_s28, 0 }
   0xf   : > { %s2581_s10 = scalar_select %p30_p1, %s2483_s26, %s32_s8  }
  0x10   : > { %p2583_p5 = por %p40_p2, %p39_p0  ;;  %p2589_p6 = por %p2845_p4, %p45_p3 }
  0x11   : > { %2855 = sst [smem:[#allocation17_spill]] %s2581_s10  ;;  %p195_p7 = scmp.eq.s32.totalorder %s2565_s28, 1 }
  0x12   : > { %s2856_s11 = scalar_select %p2583_p5, 1, 0 }
  0x13   : > { %s2857_s12 = scalar_select %p2589_p6, 1, 0 }
  0x14   : > { %p201_p8 = scmp.eq.s32.totalorder %s1786_s29, 1  ;;  %p1787_p9 = scmp.ge.s32.totalorder %s2487_s27, 1 }
  0x15   : > { %p208_p10 = scmp.lt.s32.totalorder %s2487_s27, 3  ;;  %p2596_p11 = por %p195_p7, %p39_p0 }
  0x16   : > { %p2600_p12 = por %p201_p8, %p45_p3  ;;  %s2489_s16 = smov [#allocation5]  }
  0x17   : > { %s2858_s13 = scalar_select %p2596_p11, 1, 0 }
  0x18   : > { %s2859_s14 = scalar_select %p2600_p12, 1, 0 }
  0x19   : > { %p2604_p13 = pnand %p1787_p9, %p208_p10  ;;  %s220_s17 = sshll.u32 %s2489_s16, 4  ;;  %s221_s17 = int_to_ptr.vmem [resolvable:$true] %s220_s17 }
  0x1a   : > { %2860 = sst [smem:[#allocation18_spill]] %s2859_s14  ;;  %s2490_s19 = smov [#allocation7]  }
  0x1b   : > { %s2861_s15 = scalar_select %p2604_p13, 1, 0 }
  0x1c   : > { %p2024_p1 = pneg %p2604_p13  ;;  %s236_s20 = sshll.u32 %s2490_s19, 4  ;;  %s2616_s20 = int_to_ptr.vmem [resolvable:$true] %s236_s20 }
  0x1d   : > { %s2863_s1 = sld [smem:[#allocation19_spill]] }
  0x1e   : > { %p2612_p2 = pnand %p2024_p1, %p2845_p4 }
  0x20   : > { %p2626_p3 = pneg %p2612_p2 }
  0x23   : > { %s2301_s23 = scalar_lea.hbm %s2863_s1, 12544 }
  0x24   : > { %p2302_p0 = scmp.ne.s32.totalorder %s2863_s1, %s2301_s23  ;;  %p2308_p9 = scmp.lt.u32.totalorder %s2301_s23, %s2863_s1 }
  0x26   : > { %p2304_p7 = pnand %p2626_p3, %p2302_p0 }
  0x28   : > { %p2305_p8 = pneg %p2304_p7 }
  0x2a   : > { %p2310_p10 = pnand %p2308_p9, %p2305_p8 }
  0x2c   : > { %2313 = shalt.err (!%p2310_p10)
}
  0x2d   : > { %s2314_s21 = scalar_lea.vmem %s221_s17, 12544  ;;  %p2322_p11 = scmp.lt.s32.totalorder %s221_s17, %s221_s17 }
  0x2e   : > { %p2315_p1 = scmp.ne.s32.totalorder %s221_s17, %s2314_s21  ;;  %p2323_p6 = scmp.lt.s32.totalorder %s2314_s21, %s2314_s21 }
  0x30   : > { %p2317_p4 = pnand %p2315_p1, %p2626_p3  ;;  %p2324_p13 = por %p2323_p6, %p2322_p11 }
  0x32   : > { %p2318_p12 = pneg %p2317_p4 }
  0x34   : > { %p2325_p5 = pnand %p2324_p13, %p2318_p12 }
  0x36   : > { %2328 = shalt.err (!%p2325_p5)
}
  0x37   : > { %s2491_s22 = smov 128   ;;  %s2492_s29 = smov 8  }
  0x38   : > { %2027 = dma.hbm_to_vmem [thread:$0]  (!%p2612_p2), %s2863_s1, 12544, %s221_s17, [#allocation6], %s2491_s22, %s2491_s22, %s2492_s29  }
  0x39   : > { %s2329_s10 = scalar_lea.hbm %s2840_s3, 4096 }
  0x3a   : > { %p2330_p4 = scmp.ne.s32.totalorder %s2840_s3, %s2329_s10  ;;  %p2336_p11 = scmp.lt.u32.totalorder %s2329_s10, %s2840_s3 }
  0x3c   : > { %p2332_p6 = pnand %p2330_p4, %p2626_p3 }
  0x3e   : > { %p2333_p5 = pneg %p2332_p6 }
  0x40   : > { %p2338_p12 = pnand %p2336_p11, %p2333_p5 }
  0x42   : > { %2341 = shalt.err (!%p2338_p12)
}
  0x43   : > { %s2342_s17 = scalar_lea.vmem %s2616_s20, 4096  ;;  %p2350_p8 = scmp.lt.s32.totalorder %s2616_s20, %s2616_s20 }
  0x44   : > { %p2343_p13 = scmp.ne.s32.totalorder %s2616_s20, %s2342_s17  ;;  %p2351_p9 = scmp.lt.s32.totalorder %s2342_s17, %s2342_s17 }
  0x46   : > { %p2345_p0 = pnand %p2343_p13, %p2626_p3  ;;  %p2352_p10 = por %p2351_p9, %p2350_p8 }
  0x48   : > { %p2346_p7 = pneg %p2345_p0 }
  0x4a   : > { %p2353_p1 = pnand %p2352_p10, %p2346_p7 }
  0x4c   : > { %2356 = shalt.err (!%p2353_p1)
}
  0x4d   : > { %2030 = dma.hbm_to_vmem [thread:$0]  (!%p2612_p2), %s2840_s3, 4096, %s2616_s20, [#allocation6], %s2491_s22, %s2491_s22, %s2492_s29  }
  0x4e   : > { %s2493_s10 = smov [#allocation8]   ;;  %s2357_s16 = scalar_lea.hbm %s2842_s5, 2048 }
  0x4f   : > { %s252_s14 = sshll.u32 %s2493_s10, 4  ;;  %p2358_p4 = scmp.ne.s32.totalorder %s2842_s5, %s2357_s16  ;;  %s253_s14 = int_to_ptr.vmem [resolvable:$true] %s252_s14 }
  0x50   : > { %p2364_p11 = scmp.lt.u32.totalorder %s2357_s16, %s2842_s5 }
  0x51   : > { %p2360_p6 = pnand %p2358_p4, %p2626_p3 }
  0x53   : > { %p2361_p5 = pneg %p2360_p6 }
  0x55   : > { %p2366_p12 = pnand %p2364_p11, %p2361_p5 }
  0x57   : > { %2369 = shalt.err (!%p2366_p12)
}
  0x58   : > { %s2370_s20 = scalar_lea.vmem %s253_s14, 2048  ;;  %p2378_p8 = scmp.lt.s32.totalorder %s253_s14, %s253_s14 }
  0x59   : > { %p2371_p13 = scmp.ne.s32.totalorder %s253_s14, %s2370_s20  ;;  %p2379_p9 = scmp.lt.s32.totalorder %s2370_s20, %s2370_s20 }
  0x5b   : > { %p2373_p0 = pnand %p2371_p13, %p2626_p3  ;;  %p2380_p10 = por %p2379_p9, %p2378_p8 }
  0x5d   : > { %p2374_p7 = pneg %p2373_p0 }
  0x5f   : > { %p2381_p1 = pnand %p2380_p10, %p2374_p7 }
  0x61   : > { %2384 = shalt.err (!%p2381_p1)
}
  0x62   : > { %s2494_s22 = smov 64   ;;  %s2495_s29 = smov 4  }
  0x63   : > { %2033 = dma.hbm_to_vmem [thread:$0]  (!%p2612_p2), %s2842_s5, 2048, %s253_s14, [#allocation9], %s2494_s22, %s2494_s22, %s2495_s29  }
  0x64   : > { %p1791_p4 = scmp.ge.s32.totalorder %s2487_s27, 2 }
  0x65   : > { %p2865_p3 = scmp.ne.s32.totalorder (!%p1791_p4), %s2856_s11, 0 }
  0x66   : > { %265 = sbr.rel (%p1791_p4) target bundleno = 145 (0x91), region = 40 }
  0x6d   : > { %268 = sbr.rel (!%p2865_p3) target bundleno = 145 (0x91), region = 44  ;;  %s269_s9 = sand.u32 (%p2865_p3), 1, %s2483_s26  }
  0x6e   : > { %s1792_s30 = sshll.u32 (%p2865_p3), %s2487_s27, 1  ;;  %s2007_s10 = smul.u32 (%p2865_p3), 112, %s269_s9 }
  0x6f   : > { %s275_s8 = ssub.s32 (%p2865_p3), 3, %s1792_s30  ;;  %s2693_s23 = scalar_lea.sflag (%p2865_p3), [#allocation3], %s269_s9 }
  0x70   : > { %p276_p6 = scmp.lt.s32.totalorder (%p2865_p3), %s275_s8, 2  ;;  %s273_s16 = scalar_lea.vmem (%p2865_p3), [#allocation2], %s2007_s10 }
  0x74   : > { %s2882_s8 = smov (!%p276_p6, %s275_s8), 2 }
  0x75   : > { %s2690_s18 = smul.u32 896, %s2882_s8 }
  0x77   : > { %s281_s14 = ssub.s32 1792, %s2690_s18 }
  0x78   : > { %282 = vsyncadd %s2693_s23, %s281_s14  ;;  %p1795_p2 = scmp.ne.s32.totalorder %s2690_s18, 0  ;;  %s2008_s11 = smul.u32 1792, %s2487_s27 }
  0x79   : > { %s288_s19 = sshll.u32 %s273_s16, 4  ;;  %s2389_s1 = scalar_lea.hbm %s2837_s0, 2688  ;;  %s2703_s19 = int_to_ptr.vmem [resolvable:$true] %s288_s19 }
  0x7a   : > { %s2701_s20 = scalar_lea.hbm %s2837_s0, %s2008_s11 }
  0x7b   : > { %s2385_s22 = scalar_lea.hbm %s2701_s20, %s2690_s18  ;;  %p2390_p13 = scmp.lt.u32.totalorder %s2701_s20, %s2837_s0 }
  0x7c   : > { %p2386_p5 = scmp.ne.s32.totalorder %s2701_s20, %s2385_s22  ;;  %p2391_p0 = scmp.lt.u32.totalorder %s2389_s1, %s2385_s22 }
  0x7d   : > { %p2393_p8 = scmp.lt.u32.totalorder %s2385_s22, %s2701_s20 }
  0x7e   : > { %p2387_p11 = pnand %p2386_p5, %p1795_p2  ;;  %p2392_p7 = por %p2391_p0, %p2390_p13 }
  0x80   : > { %p2388_p12 = pneg %p2387_p11  ;;  %p2394_p9 = por %p2393_p8, %p2392_p7 }
  0x82   : > { %p2395_p10 = pnand %p2394_p9, %p2388_p12 }
  0x84   : > { %2398 = shalt.err (!%p2395_p10)
}
  0x85   : > { %s2399_s10 = scalar_lea.vmem %s2703_s19, %s2690_s18  ;;  %s2496_s8 = smov [#allocation2]  }
  0x86   : > { %p2400_p1 = scmp.ne.s32.totalorder %s2703_s19, %s2399_s10  ;;  %s2403_s14 = sshll.u32 %s2496_s8, 4  ;;  %s2404_s14 = int_to_ptr.vmem [resolvable:$false] %s2403_s14 }
  0x87   : > { %s2405_s16 = scalar_lea.vmem %s2404_s14, 3584  ;;  %p2406_p5 = scmp.lt.s32.totalorder %s2703_s19, %s2404_s14 }
  0x88   : > { %p2401_p3 = pnand %p2400_p1, %p1795_p2  ;;  %p2407_p11 = scmp.lt.s32.totalorder %s2405_s16, %s2399_s10 }
  0x8a   : > { %p2402_p6 = pneg %p2401_p3  ;;  %p2408_p13 = por %p2407_p11, %p2406_p5 }
  0x8c   : > { %p2409_p0 = pnand %p2408_p13, %p2402_p6 }
  0x8e   : > { %2412 = shalt.err (!%p2409_p0)
}
  0x8f   : > { %s2497_s11 = smov 896   ;;  %s2498_s21 = smov 56  }
  0x90   : > { %294 = dma.hbm_to_vmem [thread:$0]  (%p1795_p2), %s2701_s20, %s2690_s18, %s2703_s19, %s2693_s23, %s2497_s11, %s2497_s11, %s2498_s21  }
  0x91 PF: > { %p2866_p12 = scmp.ne.s32.totalorder %s2861_s15, 0 }
  0x92   : > { %s2733_s17 = sand.u32 (!%p2866_p12), 1, %s2479_s25   ;;  %p2867_p7 = scmp.ne.s32.totalorder (!%p2866_p12), %s2857_s12, 0 }
  0x93   : > { %300 = sbr.rel (%p2866_p12) target bundleno = 1006 (0x3ee), region = 48  ;;  %s303_s29 = scalar_lea.sflag (!%p2866_p12), [#allocation3], %s2733_s17 }
  0x94   : > { %s2009_s22 = smul.u32 (!%p2866_p12), 112, %s2733_s17 }
  0x96   : > { %s2737_s24 = scalar_lea.vmem (!%p2866_p12), [#allocation2], %s2009_s22 }
  0x9a   : > { %2458 = dma.done.wait (%p2867_p7), %s303_s29, 1792  }
  0x9b   : > { %2460 = vsyncadd (%p2867_p7), %s303_s29, 4294965504  ;;  %p2868_p2 = scmp.eq.s32.totalorder %s2565_s28, 0 }
  0x9d   : > { %2462 = dma.done.wait (%p2868_p2), [#allocation6], 16640   ;;  %p2869_p8 = pmov %p2868_p2 }
  0x9e   : > { %p2870_p9 = pmov %p2868_p2 }
  0x9f   : > { %2464 = vsyncadd (%p2869_p8), [#allocation6], 4294950656 }
  0xa0   : > { %2466 = dma.done.wait (%p2870_p9), [#allocation9], 2048   ;;  %p2871_p10 = pmov %p2868_p2 }
  0xa1   : > { %v2090_v0 = vld [vmem:[#allocation5 + $0x104] ss:$8 sps:$4 sm:$0xff]   ;;  %v2092_v1 = vld [vmem:[#allocation5 + $0x100] ss:$8 sps:$4 sm:$0xff]   ;;  %v2093_v2 = vld [vmem:[#allocation5 + $0x114] ss:$8 sps:$4 sm:$0xff]  }
  0xa2   : > { %2468 = vsyncadd (%p2871_p10), [#allocation9], 4294965248  ;;  %1018 = vmatprep.subr.bf16.mxu0 %v2090_v0  ;;  %v2095_v3 = vld [vmem:[#allocation5 + $0x110] ss:$8 sps:$4 sm:$0xff]   ;;  %v2096_v4 = vld [vmem:[#allocation5 + $0x124] ss:$8 sps:$4 sm:$0xff]  }
  0xa3   : > { %1019 = vmatpush1.bf16.msra.mxu0 %v2092_v1  ;;  %v2098_v5 = vld [vmem:[#allocation5 + $0x120] ss:$8 sps:$4 sm:$0xff]   ;;  %v2099_v6 = vld [vmem:[#allocation5 + $0x134] ss:$8 sps:$4 sm:$0xff]   ;;  %v2101_v7 = vld [vmem:[#allocation5 + $0x130] ss:$8 sps:$4 sm:$0xff]  }
  0xa4   : > { %1020 = vmatprep.subr.bf16.mxu0 %v2093_v2  ;;  %v2102_v8 = vld [vmem:[#allocation5 + $0x144] ss:$8 sps:$4 sm:$0xff]   ;;  %v2104_v9 = vld [vmem:[#allocation5 + $0x140] ss:$8 sps:$4 sm:$0xff]   ;;  %v2105_v10 = vld [vmem:[#allocation5 + $0x154] ss:$8 sps:$4 sm:$0xff]  }
  0xa5   : > { %v2107_v11 = vld [vmem:[#allocation5 + $0x150] ss:$8 sps:$4 sm:$0xff]   ;;  %v2108_v12 = vld [vmem:[#allocation5 + $0x164] ss:$8 sps:$4 sm:$0xff]   ;;  %v2110_v16 = vld [vmem:[#allocation5 + $0x160] ss:$8 sps:$4 sm:$0xff]  }
  0xa6   : > { %v365_v13 = vld [vmem:[%s2737_s24 + $0x18] sm:$0xff]  ;;  %v372_v14 = vld [vmem:[%s2737_s24 + $0x50] sm:$0xff]  ;;  %v371_v54 = vld [vmem:[%s2737_s24 + $0x48] sm:$0xff]  ;;  %vm971_vm0 = vcmask 130048   ;;  %s1803_s1 = sshll.u32 %s2733_s17, 3  ;;  %s1665_s30 = scalar_lea.sflag [#allocation4], %s2733_s17 }
  0xa7   : > { %1021 = vmatpush1.bf16.msra.mxu0 %v2095_v3  ;;  %v379_v15 = vpack.c.bf16 %v372_v14, %v365_v13  ;;  %v2111_v17 = vld [vmem:[#allocation5 + $0x174] ss:$8 sps:$4 sm:$0xff]   ;;  %v2113_v18 = vld [vmem:[#allocation5 + $0x170] ss:$8 sps:$4 sm:$0xff]   ;;  %v2147_v19 = vld [vmem:[#allocation5 + $0x4] ss:$8 sps:$4 sm:$0xff]  }
  0xa8   : > { %1022 = vmatprep.subr.bf16.mxu0 %v2096_v4  ;;  %v2149_v20 = vld [vmem:[#allocation5] ss:$8 sps:$4 sm:$0xff]   ;;  %v2114_v21 = vld [vmem:[#allocation5 + $0x184] ss:$8 sps:$4 sm:$0xff]   ;;  %975 = vmatprep.subr.bf16.mxu1 %v2147_v19  ;;  %v2153_v22 = vld [vmem:[#allocation5 + $0x14] ss:$8 sps:$4 sm:$0xff]  }
  0xa9   : > { %1050 = vmatprep.mubr.bf16.mxu0 %v379_v15  ;;  %976 = vmatpush1.bf16.msra.mxu1 %v2149_v20  ;;  %v2155_v23 = vld [vmem:[#allocation5 + $0x10] ss:$8 sps:$4 sm:$0xff]   ;;  %v2116_v24 = vld [vmem:[#allocation5 + $0x180] ss:$8 sps:$4 sm:$0xff]   ;;  %v2117_v25 = vld [vmem:[#allocation5 + $0x194] ss:$8 sps:$4 sm:$0xff]  }
  0xaa   : > { %977 = vmatprep.subr.bf16.mxu1 %v2153_v22  ;;  %v2159_v26 = vld [vmem:[#allocation5 + $0x24] ss:$8 sps:$4 sm:$0xff]   ;;  %v2161_v27 = vld [vmem:[#allocation5 + $0x20] ss:$8 sps:$4 sm:$0xff]   ;;  %v2119_v28 = vld [vmem:[#allocation5 + $0x190] ss:$8 sps:$4 sm:$0xff]  }
  0xab   : > { %1023 = vmatpush1.bf16.msra.mxu0 %v2098_v5  ;;  %v2165_v29 = vld [vmem:[#allocation5 + $0x34] ss:$8 sps:$4 sm:$0xff]   ;;  %v2120_v30 = vld [vmem:[#allocation5 + $0x1a4] ss:$8 sps:$4 sm:$0xff]   ;;  %v2167_v31 = vld [vmem:[#allocation5 + $0x30] ss:$8 sps:$4 sm:$0xff]  }
  0xac   : > { %1024 = vmatprep.subr.bf16.mxu0 %v2099_v6  ;;  %v2122_v32 = vld [vmem:[#allocation5 + $0x1a0] ss:$8 sps:$4 sm:$0xff]   ;;  %v2171_v33 = vld [vmem:[#allocation5 + $0x44] ss:$8 sps:$4 sm:$0xff]   ;;  %v2123_v34 = vld [vmem:[#allocation5 + $0x1b4] ss:$8 sps:$4 sm:$0xff]  }
  0xad   : > { %978 = vmatpush1.bf16.msra.mxu1 %v2155_v23  ;;  %v2173_v35 = vld [vmem:[#allocation5 + $0x40] ss:$8 sps:$4 sm:$0xff]   ;;  %v2125_v36 = vld [vmem:[#allocation5 + $0x1b0] ss:$8 sps:$4 sm:$0xff]   ;;  %v2177_v37 = vld [vmem:[#allocation5 + $0x54] ss:$8 sps:$4 sm:$0xff]  }
  0xae   : > { %979 = vmatprep.subr.bf16.mxu1 %v2159_v26  ;;  %v2126_v38 = vld [vmem:[#allocation5 + $0x1c4] ss:$8 sps:$4 sm:$0xff]   ;;  %v2179_v39 = vld [vmem:[#allocation5 + $0x50] ss:$8 sps:$4 sm:$0xff]   ;;  %v2128_v40 = vld [vmem:[#allocation5 + $0x1c0] ss:$8 sps:$4 sm:$0xff]  }
  0xaf   : > { %1025 = vmatpush1.bf16.msra.mxu0 %v2101_v7  ;;  %v2183_v41 = vld [vmem:[#allocation5 + $0x64] ss:$8 sps:$4 sm:$0xff]   ;;  %v2129_v42 = vld [vmem:[#allocation5 + $0x1d4] ss:$8 sps:$4 sm:$0xff]   ;;  %v2185_v43 = vld [vmem:[#allocation5 + $0x60] ss:$8 sps:$4 sm:$0xff]  }
  0xb0   : > { %1026 = vmatprep.subr.bf16.mxu0 %v2102_v8  ;;  %v2131_v44 = vld [vmem:[#allocation5 + $0x1d0] ss:$8 sps:$4 sm:$0xff]   ;;  %v2189_v45 = vld [vmem:[#allocation5 + $0x74] ss:$8 sps:$4 sm:$0xff]   ;;  %v2132_v46 = vld [vmem:[#allocation5 + $0x1e4] ss:$8 sps:$4 sm:$0xff]  }
  0xb1   : > { %980 = vmatpush1.bf16.msra.mxu1 %v2161_v27  ;;  %v2191_v47 = vld [vmem:[#allocation5 + $0x70] ss:$8 sps:$4 sm:$0xff]   ;;  %v2134_v48 = vld [vmem:[#allocation5 + $0x1e0] ss:$8 sps:$4 sm:$0xff]   ;;  %v2195_v49 = vld [vmem:[#allocation5 + $0x84] ss:$8 sps:$4 sm:$0xff]  }
  0xb2   : > { %981 = vmatprep.subr.bf16.mxu1 %v2165_v29  ;;  %v2135_v50 = vld [vmem:[#allocation5 + $0x1f4] ss:$8 sps:$4 sm:$0xff]   ;;  %v2137_v51 = vld [vmem:[#allocation5 + $0x1f0] ss:$8 sps:$4 sm:$0xff]   ;;  %v2197_v53 = vld [vmem:[#allocation5 + $0x80] ss:$8 sps:$4 sm:$0xff]  }
  0xb3   : > { %1027 = vmatpush1.bf16.msra.mxu0 %v2104_v9  ;;  %v364_v52 = vld [vmem:[%s2737_s24 + $0x10] sm:$0xff]  ;;  %v367_v59 = vld [vmem:[%s2737_s24 + $0x28] sm:$0xff]  ;;  %v374_v62 = vld [vmem:[%s2737_s24 + $0x60] sm:$0xff]  ;;  %s348_s9 = scalar_lea.vmem [#allocation10], %s1803_s1  ;;  %p2872_p1 = scmp.ne.s32.totalorder %s2858_s13, 0 }
  0xb4   : > { %1028 = vmatprep.subr.bf16.mxu0 %v2105_v10  ;;  %v2201_v55 = vld [vmem:[#allocation5 + $0x94] ss:$8 sps:$4 sm:$0xff]   ;;  %v2140_v56 = vld [vmem:[#allocation5 + $0x204] ss:$8 sps:$4 sm:$0xff]   ;;  %v378_v57 = vpack.c.bf16 %v371_v54, %v364_v52  ;;  %v2203_v58 = vld [vmem:[#allocation5 + $0x90] ss:$8 sps:$4 sm:$0xff]   ;;  %v381_v0 = vpack.c.bf16 %v374_v62, %v367_v59 }
  0xb5   : > { %982 = vmatpush1.bf16.msra.mxu1 %v2167_v31  ;;  %v2138_v60 = vld [vmem:[#allocation5 + $0x200] ss:$8 sps:$4 sm:$0xff]   ;;  %v2207_v61 = vld [vmem:[#allocation5 + $0xa4] ss:$8 sps:$4 sm:$0xff]   ;;  %v2143_v63 = vld [vmem:[#allocation5 + $0x214] ss:$8 sps:$4 sm:$0xff]  }
  0xb6   : > { %983 = vmatprep.subr.bf16.mxu1 %v2171_v33  ;;  %v2209_v1 = vld [vmem:[#allocation5 + $0xa0] ss:$8 sps:$4 sm:$0xff]   ;;  %v2141_v2 = vld [vmem:[#allocation5 + $0x210] ss:$8 sps:$4 sm:$0xff]   ;;  %v2213_v3 = vld [vmem:[#allocation5 + $0xb4] ss:$8 sps:$4 sm:$0xff]  }
  0xb7   : > { %1029 = vmatpush1.bf16.msra.mxu0 %v2107_v11  ;;  %v2146_v4 = vld [vmem:[#allocation5 + $0x224] ss:$8 sps:$4 sm:$0xff]   ;;  %v2144_v7 = vld [vmem:[#allocation5 + $0x220] ss:$8 sps:$4 sm:$0xff]   ;;  %v2215_v9 = vld [vmem:[#allocation5 + $0xb0] ss:$8 sps:$4 sm:$0xff]  }
  0xb8   : > { %1030 = vmatprep.subr.bf16.mxu0 %v2108_v12  ;;  %v363_v5 = vld [vmem:[%s2737_s24 + $0x8] sm:$0xff]  ;;  %v370_v6 = vld [vmem:[%s2737_s24 + $0x40] sm:$0xff]  ;;  %v369_v27 = vld [vmem:[%s2737_s24 + $0x38] sm:$0xff]  ;;  %s1957_s10 = sshll.u32 (%p2872_p1), %s2565_s28, 1 }
  0xb9   : > { %984 = vmatpush1.bf16.msra.mxu1 %v2173_v35  ;;  %v377_v8 = vpack.c.bf16 %v370_v6, %v363_v5  ;;  %v2219_v10 = vld [vmem:[#allocation5 + $0xc4] ss:$8 sps:$4 sm:$0xff]   ;;  %v2152_v11 = vld [vmem:[#allocation5 + $0x234] ss:$8 sps:$4 sm:$0xff]   ;;  %v2150_v12 = vld [vmem:[#allocation5 + $0x230] ss:$8 sps:$4 sm:$0xff]  }
  0xba   : > { %985 = vmatprep.subr.bf16.mxu1 %v2177_v37  ;;  %v2221_v13 = vld [vmem:[#allocation5 + $0xc0] ss:$8 sps:$4 sm:$0xff]   ;;  %v2225_v14 = vld [vmem:[#allocation5 + $0xd4] ss:$8 sps:$4 sm:$0xff]   ;;  %v2158_v15 = vld [vmem:[#allocation5 + $0x244] ss:$8 sps:$4 sm:$0xff]  }
  0xbb   : > { %1031 = vmatpush1.bf16.msra.mxu0 %v2110_v16  ;;  %1007 = vmatprep.mubr.bf16.mxu1 %v377_v8  ;;  %v2156_v16 = vld [vmem:[#allocation5 + $0x240] ss:$8 sps:$4 sm:$0xff]   ;;  %v2164_v19 = vld [vmem:[#allocation5 + $0x254] ss:$8 sps:$4 sm:$0xff]   ;;  %v2162_v20 = vld [vmem:[#allocation5 + $0x250] ss:$8 sps:$4 sm:$0xff]  }
  0xbc   : > { %1032 = vmatprep.subr.bf16.mxu0 %v2111_v17  ;;  %v2227_v17 = vld [vmem:[#allocation5 + $0xd0] ss:$8 sps:$4 sm:$0xff]   ;;  %v2233_v22 = vld [vmem:[#allocation5 + $0xe0] ss:$8 sps:$4 sm:$0xff]   ;;  %v2234_v23 = vld [vmem:[#allocation5 + $0xf4] ss:$8 sps:$4 sm:$0xff]  }
  0xbd   : > { %986 = vmatpush1.bf16.msra.mxu1 %v2179_v39  ;;  %v2168_v26 = vld [vmem:[#allocation5 + $0x260] ss:$8 sps:$4 sm:$0xff]   ;;  %v2176_v29 = vld [vmem:[#allocation5 + $0x274] ss:$8 sps:$4 sm:$0xff]   ;;  %v2174_v31 = vld [vmem:[#allocation5 + $0x270] ss:$8 sps:$4 sm:$0xff]  }
  0xbe   : > { %987 = vmatprep.subr.bf16.mxu1 %v2183_v41  ;;  %v2242_v33 = vld [vmem:[#allocation7 + $0x14] ss:$8 sps:$4 sm:$0xff]   ;;  %v2240_v35 = vld [vmem:[#allocation7 + $0x10] ss:$8 sps:$4 sm:$0xff]   ;;  %v2245_v37 = vld [vmem:[#allocation7 + $0x24] ss:$8 sps:$4 sm:$0xff]  }
  0xbf   : > { %1033 = vmatpush1.bf16.msra.mxu0 %v2113_v18  ;;  %v2231_v18 = vld [vmem:[#allocation5 + $0xe4] ss:$8 sps:$4 sm:$0xff]   ;;  %v2243_v39 = vld [vmem:[#allocation7 + $0x20] ss:$8 sps:$4 sm:$0xff]   ;;  %v2204_v52 = vld [vmem:[#allocation5 + $0x2c0] ss:$8 sps:$4 sm:$0xff]  }
  0xc0   : > { %1034 = vmatprep.subr.bf16.mxu0 %v2114_v21  ;;  %v2170_v21 = vld [vmem:[#allocation5 + $0x264] ss:$8 sps:$4 sm:$0xff]   ;;  %v2212_v54 = vld [vmem:[#allocation5 + $0x2d4] ss:$8 sps:$4 sm:$0xff]   ;;  %v2258_v59 = vld [vmem:[#allocation7 + $0x70] ss:$8 sps:$4 sm:$0xff]  }
  0xc1   : > { %988 = vmatpush1.bf16.msra.mxu1 %v2185_v43  ;;  %v2248_v41 = vld [vmem:[#allocation7 + $0x34] ss:$8 sps:$4 sm:$0xff]   ;;  %v2246_v43 = vld [vmem:[#allocation7 + $0x30] ss:$8 sps:$4 sm:$0xff]   ;;  %v2224_v62 = vld [vmem:[#allocation5 + $0x2f4] ss:$8 sps:$4 sm:$0xff]  }
  0xc2   : > { %989 = vmatprep.subr.bf16.mxu1 %v2189_v45  ;;  %v2251_v45 = vld [vmem:[#allocation7 + $0x44] ss:$8 sps:$4 sm:$0xff]   ;;  %v2264_v6 = vld [vmem:[#allocation7 + $0x90] ss:$8 sps:$4 sm:$0xff]   ;;  %s1673_s8 = ssub.s32 (%p2872_p1), 3, %s1957_s10 }
  0xc3   : > { %1035 = vmatpush1.bf16.msra.mxu0 %v2116_v24  ;;  %v2236_v24 = vld [vmem:[#allocation5 + $0xf0] ss:$8 sps:$4 sm:$0xff]   ;;  %v2269_v8 = vld [vmem:[#allocation7 + $0xa4] ss:$8 sps:$4 sm:$0xff]   ;;  %p1674_p3 = scmp.lt.s32.totalorder (%p2872_p1), %s1673_s8, 2 }
  0xc4   : > { %1036 = vmatprep.subr.bf16.mxu0 %v2117_v25  ;;  %v362_v25 = vld [vmem:[%s2737_s24] sm:$0xff] }
  0xc5   : > { %990 = vmatpush1.bf16.msra.mxu1 %v2191_v47  ;;  %v2249_v47 = vld [vmem:[#allocation7 + $0x40] ss:$8 sps:$4 sm:$0xff]  }
  0xc6   : > { %991 = vmatprep.subr.bf16.mxu1 %v2195_v49  ;;  %v2254_v49 = vld [vmem:[#allocation7 + $0x54] ss:$8 sps:$4 sm:$0xff]  }
  0xc7   : > { %1037 = vmatpush1.bf16.msra.mxu0 %v2119_v28  ;;  %v2239_v28 = vld [vmem:[#allocation7 + $0x4] ss:$8 sps:$4 sm:$0xff]  }
  0xc8   : > { %1038 = vmatprep.subr.bf16.mxu0 %v2120_v30  ;;  %v2237_v30 = vld [vmem:[#allocation7] ss:$8 sps:$4 sm:$0xff]  }
  0xc9   : > { %992 = vmatpush1.bf16.msra.mxu1 %v2197_v53  ;;  %v2257_v53 = vld [vmem:[#allocation7 + $0x64] ss:$8 sps:$4 sm:$0xff]  }
  0xca   : > { %993 = vmatprep.subr.bf16.mxu1 %v2201_v55  ;;  %v2255_v55 = vld [vmem:[#allocation7 + $0x60] ss:$8 sps:$4 sm:$0xff]  }
  0xcb   : > { %1039 = vmatpush1.bf16.msra.mxu0 %v2122_v32  ;;  %v376_v32 = vpack.c.bf16 %v369_v27, %v362_v25 }
  0xcc   : > { %1040 = vmatprep.subr.bf16.mxu0 %v2123_v34  ;;  %v2182_v34 = vld [vmem:[#allocation5 + $0x284] ss:$8 sps:$4 sm:$0xff]  }
  0xcd   : > { %994 = vmatpush1.bf16.msra.mxu1 %v2203_v58  ;;  %v2218_v58 = vld [vmem:[#allocation5 + $0x2e4] ss:$8 sps:$4 sm:$0xff]  }
  0xce   : > { %995 = vmatprep.subr.bf16.mxu1 %v2207_v61  ;;  %v2263_v61 = vld [vmem:[#allocation7 + $0x84] ss:$8 sps:$4 sm:$0xff]  }
  0xcf   : > { %1041 = vmatpush1.bf16.msra.mxu0 %v2125_v36  ;;  %v2180_v36 = vld [vmem:[#allocation5 + $0x280] ss:$8 sps:$4 sm:$0xff]  }
  0xd0   : > { %1042 = vmatprep.subr.bf16.mxu0 %v2126_v38  ;;  %v2188_v38 = vld [vmem:[#allocation5 + $0x294] ss:$8 sps:$4 sm:$0xff]  }
  0xd1   : > { %996 = vmatpush1.bf16.msra.mxu1 %v2209_v1  ;;  %v366_v1 = vld [vmem:[%s2737_s24 + $0x20] sm:$0xff] }
  0xd2   : > { %997 = vmatprep.subr.bf16.mxu1 %v2213_v3  ;;  %v2266_v3 = vld [vmem:[#allocation7 + $0x94] ss:$8 sps:$4 sm:$0xff]  }
  0xd3   : > { %1043 = vmatpush1.bf16.msra.mxu0 %v2128_v40  ;;  %v2186_v40 = vld [vmem:[#allocation5 + $0x290] ss:$8 sps:$4 sm:$0xff]  }
  0xd4   : > { %1044 = vmatprep.subr.bf16.mxu0 %v2129_v42  ;;  %v2194_v42 = vld [vmem:[#allocation5 + $0x2a4] ss:$8 sps:$4 sm:$0xff]  }
  0xd5   : > { %998 = vmatpush1.bf16.msra.mxu1 %v2215_v9  ;;  %v2267_v9 = vld [vmem:[#allocation7 + $0xa0] ss:$8 sps:$4 sm:$0xff]  }
  0xd6   : > { %999 = vmatprep.subr.bf16.mxu1 %v2219_v10  ;;  %v2499_v10 = vmov 0  }
  0xd7   : > { %1045 = vmatpush1.bf16.msra.mxu0 %v2131_v44  ;;  %v2192_v44 = vld [vmem:[#allocation5 + $0x2a0] ss:$8 sps:$4 sm:$0xff]  }
  0xd8   : > { %1046 = vmatprep.subr.bf16.mxu0 %v2132_v46  ;;  %v2200_v46 = vld [vmem:[#allocation5 + $0x2b4] ss:$8 sps:$4 sm:$0xff]  }
  0xd9   : > { %1000 = vmatpush1.bf16.msra.mxu1 %v2221_v13  ;;  %v368_v13 = vld [vmem:[%s2737_s24 + $0x30] sm:$0xff] }
  0xda   : > { %1001 = vmatprep.subr.bf16.mxu1 %v2225_v14  ;;  %v375_v14 = vld [vmem:[%s2737_s24 + $0x68] sm:$0xff] }
  0xdb   : > { %1047 = vmatpush1.bf16.msra.mxu0 %v2134_v48  ;;  %v2198_v48 = vld [vmem:[#allocation5 + $0x2b0] ss:$8 sps:$4 sm:$0xff]  }
  0xdc   : > { %1048 = vmatprep.subr.bf16.mxu0 %v2135_v50  ;;  %v2206_v50 = vld [vmem:[#allocation5 + $0x2c4] ss:$8 sps:$4 sm:$0xff]  }
  0xdd   : > { %1002 = vmatpush1.bf16.msra.mxu1 %v2227_v17  ;;  %v2275_v17 = vld [vmem:[#allocation7 + $0xc4] ss:$8 sps:$4 sm:$0xff]  }
  0xde   : > { %1003 = vmatprep.subr.bf16.mxu1 %v2231_v18  ;;  %v2278_v18 = vld [vmem:[#allocation7 + $0xd4] ss:$8 sps:$4 sm:$0xff]  }
  0xdf   : > { %1049 = vmatpush1.bf16.msra.mxu0 %v2137_v51  ;;  %v2252_v51 = vld [vmem:[#allocation7 + $0x50] ss:$8 sps:$4 sm:$0xff]  }
  0xe0   : > { %1061 = vmatprep.subr.bf16.mxu0 %v2140_v56  ;;  %v2210_v56 = vld [vmem:[#allocation5 + $0x2d0] ss:$8 sps:$4 sm:$0xff]  }
  0xe1   : > { %1004 = vmatpush1.bf16.msra.mxu1 %v2233_v22  ;;  %v2284_v22 = vld [vmem:[#allocation7 + $0xf4] ss:$8 sps:$4 sm:$0xff]  }
  0xe2   : > { %1051 = vmatmul.mubr.bf16.vlgmr.msra.gmra.mrb[0].mxu0 %v378_v57  ;;  %1005 = vmatprep.subr.bf16.mxu1 %v2234_v23  ;;  %v2260_v57 = vld [vmem:[#allocation7 + $0x74] ss:$8 sps:$4 sm:$0xff]   ;;  %v2282_v23 = vld [vmem:[#allocation7 + $0xf0] ss:$8 sps:$4 sm:$0xff]  }
  0xe3   : > { %1062 = vmatpush1.bf16.msra.mxu0 %v2138_v60  ;;  %1093 = vmatprep.mubr.bf16.mxu0 %v381_v0  ;;  %v2216_v60 = vld [vmem:[#allocation5 + $0x2e0] ss:$8 sps:$4 sm:$0xff]   ;;  %v2261_v0 = vld [vmem:[#allocation7 + $0x80] ss:$8 sps:$4 sm:$0xff]  }
  0xe4   : > { %1063 = vmatprep.subr.bf16.mxu0 %v2143_v63  ;;  %v2222_v63 = vld [vmem:[#allocation5 + $0x2f0] ss:$8 sps:$4 sm:$0xff]  }
  0xe5   : > { %1006 = vmatpush1.bf16.msra.mxu1 %v2236_v24  ;;  %v2285_v24 = vld [vmem:[#allocation8 + $0x40] sm:$0xff]  }
  0xe6   : > { %1385 = vmatprep.subr.bf16.mxu1 %v2239_v28 }
  0xe7   : > { %1064 = vmatpush1.bf16.msra.mxu0 %v2141_v2  ;;  %v373_v2 = vld [vmem:[%s2737_s24 + $0x58] sm:$0xff] }
  0xe8   : > { %1065 = vmatprep.subr.bf16.mxu0 %v2146_v4  ;;  %1008 = vmatmul.mubr.bf16.vlgmr.msra.gmra.mrb[0].mxu1 %v376_v32  ;;  %v2230_v4 = vld [vmem:[#allocation5 + $0x304] ss:$8 sps:$4 sm:$0xff]   ;;  %v380_v5 = vpack.c.bf16 %v373_v2, %v366_v1 }
  0xe9   : > { %1386 = vmatpush1.bf16.msra.mxu1 %v2237_v30  ;;  %v2291_v1 = vld [vmem:[#allocation8 + $0x58] sm:$0xff]  }
  0xea   : > { %1387 = vmatprep.subr.bf16.mxu1 %v2242_v33  ;;  %v2292_v2 = vld [vmem:[#allocation8 + $0x18] sm:$0xff]  }
  0xeb   : > { %1066 = vmatpush1.bf16.msra.mxu0 %v2144_v7  ;;  %v2228_v7 = vld [vmem:[#allocation5 + $0x300] ss:$8 sps:$4 sm:$0xff]  }
  0xec   : > { %1067 = vmatprep.subr.bf16.mxu0 %v2152_v11  ;;  %v2272_v11 = vld [vmem:[#allocation7 + $0xb4] ss:$8 sps:$4 sm:$0xff]  }
  0xed   : > { %1388 = vmatpush1.bf16.msra.mxu1 %v2240_v35 }
  0xee   : > { %1389 = vmatprep.subr.bf16.mxu1 %v2245_v37 }
  0xef   : > { %1068 = vmatpush1.bf16.msra.mxu0 %v2150_v12  ;;  %v2270_v12 = vld [vmem:[#allocation7 + $0xb0] ss:$8 sps:$4 sm:$0xff]  }
  0xf0   : > { %1069 = vmatprep.subr.bf16.mxu0 %v2158_v15  ;;  %v382_v15 = vpack.c.bf16 %v375_v14, %v368_v13 }
  0xf1   : > { %1390 = vmatpush1.bf16.msra.mxu1 %v2243_v39 }
  0xf2   : > { %1391 = vmatprep.subr.bf16.mxu1 %v2248_v41 }
  0xf3   : > { %1070 = vmatpush1.bf16.msra.mxu0 %v2156_v16  ;;  %v2273_v16 = vld [vmem:[#allocation7 + $0xc0] ss:$8 sps:$4 sm:$0xff]  }
  0xf4   : > { %1071 = vmatprep.subr.bf16.mxu0 %v2164_v19  ;;  %v2276_v19 = vld [vmem:[#allocation7 + $0xd0] ss:$8 sps:$4 sm:$0xff]  }
  0xf5   : > { %1392 = vmatpush1.bf16.msra.mxu1 %v2246_v43 }
  0xf6   : > { %1393 = vmatprep.subr.bf16.mxu1 %v2251_v45 }
  0xf7   : > { %1072 = vmatpush1.bf16.msra.mxu0 %v2162_v20  ;;  %v2281_v20 = vld [vmem:[#allocation7 + $0xe4] ss:$8 sps:$4 sm:$0xff]  }
  0xf8   : > { %1073 = vmatprep.subr.bf16.mxu0 %v2170_v21  ;;  %v2279_v21 = vld [vmem:[#allocation7 + $0xe0] ss:$8 sps:$4 sm:$0xff]  }
  0xf9   : > { %1394 = vmatpush1.bf16.msra.mxu1 %v2249_v47 }
  0xfa   : > { %1395 = vmatprep.subr.bf16.mxu1 %v2254_v49 }
  0xfb   : > { %1074 = vmatpush1.bf16.msra.mxu0 %v2168_v26 }
  0xfc   : > { %1075 = vmatprep.subr.bf16.mxu0 %v2176_v29  ;;  %v2500_v29 = vmov 1966171168  }
  0xfd   : > { %1396 = vmatpush1.bf16.msra.mxu1 %v2252_v51  ;;  %v1160_v30 = vunpack.c.l.s4 %v2500_v29 }
  0xfe   : > { %1397 = vmatprep.subr.bf16.mxu1 %v2257_v53 }
  0xff   : > { %1076 = vmatpush1.bf16.msra.mxu0 %v2174_v31  ;;  %v1162_v31 = vlaneseq  ;;  %v1161_v32 = vunpack.c.0.s8 %v1160_v30 }
 0x100   : > { %1077 = vmatprep.subr.bf16.mxu0 %v2182_v34  ;;  %v1903_v34 = vld.sshfl [vmem:[%s2839_s2] sm:$0x11 pattern:$0x75316420] }
 0x101   : > { %1398 = vmatpush1.bf16.msra.mxu1 %v2255_v55  ;;  %v1163_v33 = vshrl.u32 %v1162_v31, 7 }
 0x102   : > { %1399 = vmatprep.subr.bf16.mxu1 %v2260_v57 }
 0x103   : > { %1078 = vmatpush1.bf16.msra.mxu0 %v2180_v36  ;;  %v1164_v35 = vsub.s32 %v1161_v32, %v1163_v33  ;;  %v1158_v36 = vcombine.high %v1903_v34, %v1903_v34  ;;  %v1937_v32 = vld [vmem:[%s2843_s6] ss:$0 sm:$0xff] }
 0x104   : > { %1079 = vmatprep.subr.bf16.mxu0 %v2188_v38 }
 0x105   : > { %1400 = vmatpush1.bf16.msra.mxu1 %v2258_v59  ;;  %v1165_v37 = vrot.slane %v1903_v34, %v1164_v35  ;;  %v1172_v38 = vrot.slane %v1158_v36, %v1164_v35  ;;  %v2286_v59 = vld [vmem:[#allocation8] sm:$0xff]  }
 0x106   : > { %1401 = vmatprep.subr.bf16.mxu1 %v2263_v61  ;;  %v2287_v61 = vld [vmem:[#allocation8 + $0x48] sm:$0xff]  }
 0x107   : > { %1080 = vmatpush1.bf16.msra.mxu0 %v2186_v40  ;;  %v1174_v39 = vpack.i.b16 %v1165_v37, %v1165_v37  ;;  %v1178_v40 = vsub.s32 0, %v1163_v33 }
 0x108   : > { %1081 = vmatprep.subr.bf16.mxu0 %v2194_v42  ;;  %v1181_v42 = vpack.i.b16 %v1172_v38, %v1172_v38 }
 0x109   : > { %1402 = vmatpush1.bf16.msra.mxu1 %v2261_v0  ;;  %v2290_v0 = vld [vmem:[#allocation8 + $0x10] sm:$0xff]  }
 0x10a   : > { %1403 = vmatprep.subr.bf16.mxu1 %v2266_v3  ;;  %v1186_v51 = vrot.slane %v1181_v42, %v1178_v40  ;;  %v2293_v3 = vld [vmem:[#allocation8 + $0x60] sm:$0xff]  }
 0x10b   : > { %1082 = vmatpush1.bf16.msra.mxu0 %v2192_v44 }
 0x10c   : > { %1083 = vmatprep.subr.bf16.mxu0 %v2200_v46 }
 0x10d   : > { %1404 = vmatpush1.bf16.msra.mxu1 %v2264_v6  ;;  %v2296_v6 = vld [vmem:[#allocation8 + $0x28] sm:$0xff]  }
 0x10e   : > { %1405 = vmatprep.subr.bf16.mxu1 %v2269_v8  ;;  %v2298_v8 = vld [vmem:[#allocation8 + $0x30] sm:$0xff]  }
 0x10f   : > { %1084 = vmatpush1.bf16.msra.mxu0 %v2198_v48  ;;  %v1179_v48 = vrot.slane %v1174_v39, %v1178_v40 }
 0x110   : > { %1085 = vmatprep.subr.bf16.mxu0 %v2206_v50 }
 0x111   : > { %1406 = vmatpush1.bf16.msra.mxu1 %v2267_v9  ;;  %v2299_v9 = vld [vmem:[#allocation8 + $0x78] sm:$0xff]  }
 0x112   : > { %1407 = vmatprep.subr.bf16.mxu1 %v2272_v11  ;;  %v1936_v11 = vld.sshfl [vmem:[%s2841_s4] sm:$0x11 pattern:$0x75316420] }
 0x113   : > { %1086 = vmatpush1.bf16.msra.mxu0 %v2204_v52  ;;  %v1446_v13 = vrot.slane %v1936_v11, %v1164_v35 }
 0x114   : > { %1087 = vmatprep.subr.bf16.mxu0 %v2212_v54 }
 0x115   : > { %1408 = vmatpush1.bf16.msra.mxu1 %v2270_v12  ;;  %v1439_v12 = vcombine.high %v1936_v11, %v1936_v11 }
 0x116   : > { %1409 = vmatprep.subr.bf16.mxu1 %v2275_v17 }
 0x117   : > { %1088 = vmatpush1.bf16.msra.mxu0 %v2210_v56  ;;  %v1453_v14 = vrot.slane %v1439_v12, %v1164_v35 }
 0x118   : > { %1089 = vmatprep.subr.bf16.mxu0 %v2218_v58 }
 0x119   : > { %1410 = vmatpush1.bf16.msra.mxu1 %v2273_v16  ;;  %v1462_v16 = vpack.i.b16 %v1453_v14, %v1453_v14 }
 0x11a   : > { %1411 = vmatprep.subr.bf16.mxu1 %v2278_v18 }
 0x11b   : > { %1090 = vmatpush1.bf16.msra.mxu0 %v2216_v60 }
 0x11c   : > { %1091 = vmatprep.subr.bf16.mxu0 %v2224_v62  ;;  %v2288_v62 = vld [vmem:[#allocation8 + $0x8] sm:$0xff]  }
 0x11d   : > { %1412 = vmatpush1.bf16.msra.mxu1 %v2276_v19 }
 0x11e   : > { %1413 = vmatprep.subr.bf16.mxu1 %v2281_v20 }
 0x11f   : > { %1092 = vmatpush1.bf16.msra.mxu0 %v2222_v63  ;;  %v2289_v63 = vld [vmem:[#allocation8 + $0x50] sm:$0xff]  }
 0x120   : > { %1104 = vmatprep.subr.bf16.mxu0 %v2230_v4  ;;  %v2294_v4 = vld [vmem:[#allocation8 + $0x20] sm:$0xff]  }
 0x121   : > { %1414 = vmatpush1.bf16.msra.mxu1 %v2279_v21  ;;  %v1467_v21 = vrot.slane %v1462_v16, %v1178_v40 }
 0x122   : > { %1094 = vmatmul.mubr.bf16.vlgmr.msra.gmra.mrb[0].mxu0 %v380_v5  ;;  %1415 = vmatprep.subr.bf16.mxu1 %v2284_v22  ;;  %v2295_v5 = vld [vmem:[#allocation8 + $0x68] sm:$0xff]  }
 0x123   : > { %1105 = vmatpush1.bf16.msra.mxu0 %v2228_v7  ;;  %1136 = vmatprep.mubr.bf16.mxu0 %v2499_v10  ;;  %v2297_v7 = vld [vmem:[#allocation8 + $0x70] sm:$0xff]   ;;  %v2300_v10 = vld [vmem:[#allocation8 + $0x38] sm:$0xff]  }
 0x125   : > { %1416 = vmatpush1.bf16.msra.mxu1 %v2282_v23 }
 0x126   : > { %1973 = vmatprep.subr.bf16.mxu1 %v2285_v24 }
 0x12e   : > { %1902 = vmatmul.mubr.msk.bf16.vlgmr.msra.gmra.mrb[0].mxu0 %vm971_vm0, %v382_v15  ;;  %v1455_v15 = vpack.i.b16 %v1446_v13, %v1446_v13 }
 0x130   : > { %v1460_v19 = vrot.slane %v1455_v15, %v1178_v40 }
 0x1bb   : > { %v1009_v25 = vpop.f32.mrb[0].mxu1 }
 0x1bc   : > { %v1011_v26 = vpop.f32.mrb[1].mxu1 }
 0x1bd   : > { %v1013_v27 = vpop.f32.mrb[2].mxu1 }
 0x1be   : > { %v1015_v28 = vpop.f32.mrb[3].mxu1 }
 0x201   : > { %v1138_v41 = vpop.f32.mrb[0].mxu0 }
 0x202   : > { %v1995_v43 = vadd.f32 %v1138_v41, %v1009_v25  ;;  %v1140_v44 = vpop.f32.mrb[1].mxu0 }
 0x203   : > { %v1996_v45 = vadd.f32 %v1140_v44, %v1011_v26  ;;  %v1142_v46 = vpop.f32.mrb[2].mxu0 }
 0x204   : > { %v1997_v47 = vadd.f32 %v1142_v46, %v1013_v27  ;;  %v1144_v49 = vpop.f32.mrb[3].mxu0 }
 0x205   : > { %v1998_v50 = vadd.f32 %v1144_v49, %v1015_v28 }
 0x206   : > { %v1147_v52 = vpack.c.bf16 %v1997_v47, %v1995_v43 }
 0x207   : > { %v1148_v53 = vpack.c.bf16 %v1998_v50, %v1996_v45 }
 0x208   : > { %v1187_v54 = vadd.bf16 %v1179_v48, %v1147_v52 }
 0x209   : > { %v1188_v55 = vadd.bf16 %v1186_v51, %v1148_v53 }
 0x20a   : > { %v1189_v56 = vmul.bf16 1009007652, %v1187_v54 }
 0x20b   : > { %v1190_v57 = vmul.bf16 1009007652, %v1188_v55 }
 0x20c   : > { %v1191_v60 = vmax.bf16 %v1189_v56, %v1187_v54 }
 0x20d   : > { %v1192_v58 = vmax.bf16 %v1190_v57, %v1188_v55 }
 0x20f   : > { %1417 = vmatprep.mubr.bf16.mxu1 %v1192_v58 }
 0x210   : > { %1418 = vmatmul.mubr.bf16.vlgmr.msra.gmra.mrb[4].mxu1 %v1191_v60 }
 0x211   : > { %1974 = vmatpush3.bf16.msra.mxu1 %v2286_v59 }
 0x212   : > { %1975 = vmatprep.subr.bf16.mxu1 %v2287_v61 }
 0x215   : > { %1976 = vmatpush3.bf16.msra.mxu1 %v2288_v62 }
 0x216   : > { %1977 = vmatprep.subr.bf16.mxu1 %v2289_v63 }
 0x219   : > { %1978 = vmatpush3.bf16.msra.mxu1 %v2290_v0 }
 0x21a   : > { %1979 = vmatprep.subr.bf16.mxu1 %v2291_v1 }
 0x21d   : > { %1980 = vmatpush3.bf16.msra.mxu1 %v2292_v2 }
 0x21e   : > { %1981 = vmatprep.subr.bf16.mxu1 %v2293_v3 }
 0x221   : > { %1982 = vmatpush3.bf16.msra.mxu1 %v2294_v4 }
 0x222   : > { %1983 = vmatprep.subr.bf16.mxu1 %v2295_v5 }
 0x225   : > { %1984 = vmatpush3.bf16.msra.mxu1 %v2296_v6 }
 0x226   : > { %1985 = vmatprep.subr.bf16.mxu1 %v2297_v7 }
 0x229   : > { %1986 = vmatpush3.bf16.msra.mxu1 %v2298_v8 }
 0x22a   : > { %1987 = vmatprep.subr.bf16.mxu1 %v2299_v9 }
 0x22d   : > { %1988 = vmatpush3.bf16.msra.mxu1 %v2300_v10 }
 0x2e3   : > { %v1419_v17 = vpop.f32.mrb[4].mxu1 }
 0x2e4   : > { %v1421_v18 = vpop.f32.mrb[5].mxu1 }
 0x2e5   : > { %v1423_v20 = vpop.f32.mrb[6].mxu1 }
 0x2e6   : > { %v1428_v22 = vpack.c.bf16 %v1423_v20, %v1419_v17  ;;  %v1425_v23 = vpop.f32.mrb[7].mxu1 }
 0x2e7   : > { %v1429_v24 = vpack.c.bf16 %v1425_v23, %v1421_v18 }
 0x2e8   : > { %v1468_v25 = vadd.bf16 %v1460_v19, %v1428_v22 }
 0x2e9   : > { %v1469_v26 = vadd.bf16 %v1467_v21, %v1429_v24 }
 0x2ea   : > { %v1470_v27 = vmul.bf16 1009007652, %v1468_v25 }
 0x2eb   : > { %v1471_v28 = vmul.bf16 1009007652, %v1469_v26 }
 0x2ec   : > { %v1472_v30 = vmax.bf16 %v1470_v27, %v1468_v25 }
 0x2ed   : > { %v1473_v29 = vmax.bf16 %v1471_v28, %v1469_v26 }
 0x2ef   : > { %1641 = vmatprep.mubr.bf16.mxu1 %v1473_v29 }
 0x2f0   : > { %1642 = vmatmul.mubr.bf16.vlgmr.msra.gmra.mrb[8].mxu1 %v1472_v30 }
 0x3c3   : > { %v1989_v31 = vpop.f32.mrb[8].mxu1 }
 0x3c4   : > { %v1990_v33 = vpop.f32.mrb[9].mxu1 }
 0x3c5   : > { %v1991_v34 = vadd.f32 %v1990_v33, %v1989_v31  ;;  %v1992_v35 = vpop.f32.mrb[10].mxu1 }
 0x3c6   : > { %v1993_v36 = vpop.f32.mrb[11].mxu1 }
 0x3c7   : > { %v1644_v37 = vadd.f32 %v1991_v34, %v1937_v32  ;;  %v1994_v38 = vadd.f32 %v1993_v36, %v1992_v35 }
 0x3c9   : > { %v1650_v39 = vmul.f32 0.01, %v1644_v37  ;;  %v1647_v40 = vadd.f32 %v1994_v38, %v1937_v32 }
 0x3cb   : > { %v1651_v41 = vmul.f32 0.01, %v1647_v40  ;;  %v1652_v42 = vmax.f32 %v1644_v37, %v1650_v39  ;;  %1671 = sbr.rel (!%p2872_p1) target bundleno = 1006 (0x3ee), region = 68 }
 0x3cd   : > { %v1653_v43 = vmax.f32 %v1647_v40, %v1651_v41 }
 0x3cf   : > { %v1971_v44 = vpack.c.bf16 %v1653_v43, %v1652_v42 }
 0x3d1   : > { %1972 = vst [vmem:[%s348_s9] sm:$0xff] %v1971_v44  }
 0x3d2   : > { %s2884_s8 = smov (!%p1674_p3, %s1673_s8), 2 }
 0x3d3   : > { %s2779_s14 = sshll.u32 %s2884_s8, 6 }
 0x3d4   : > { %s1678_s16 = ssub.s32 128, %s2779_s14 }
 0x3d5   : > { %1679 = vsyncadd %s1665_s30, %s1678_s16  ;;  %p1959_p6 = scmp.ne.s32.totalorder %s2779_s14, 0  ;;  %s1967_s11 = sshll.u32 %s2565_s28, 7 }
 0x3d6   : > { %s2789_s22 = scalar_lea.hbm %s2844_s7, %s1967_s11  ;;  %s1684_s29 = sshll.u32 %s348_s9, 4  ;;  %s2791_s29 = int_to_ptr.vmem [resolvable:$true] %s1684_s29 }
 0x3d7   : > { %s2413_s24 = scalar_lea.vmem %s2791_s29, %s2779_s14  ;;  %s2501_s12 = smov [#allocation10]  }
 0x3d8   : > { %p2414_p5 = scmp.ne.s32.totalorder %s2791_s29, %s2413_s24  ;;  %s2417_s15 = sshll.u32 %s2501_s12, 4  ;;  %s2418_s15 = int_to_ptr.vmem [resolvable:$false] %s2417_s15 }
 0x3d9   : > { %s2419_s28 = scalar_lea.vmem %s2418_s15, 256  ;;  %p2420_p0 = scmp.lt.s32.totalorder %s2791_s29, %s2418_s15 }
 0x3da   : > { %p2415_p11 = pnand %p2414_p5, %p1959_p6  ;;  %p2421_p12 = scmp.lt.s32.totalorder %s2419_s28, %s2413_s24 }
 0x3dc   : > { %p2416_p13 = pneg %p2415_p11  ;;  %p2422_p7 = por %p2421_p12, %p2420_p0 }
 0x3de   : > { %p2423_p2 = pnand %p2422_p7, %p2416_p13 }
 0x3e0   : > { %2426 = shalt.err (!%p2423_p2)
}
 0x3e1   : > { %s2427_s18 = scalar_lea.hbm %s2789_s22, %s2779_s14  ;;  %s2431_s20 = scalar_lea.hbm %s2844_s7, 192 }
 0x3e2   : > { %p2428_p8 = scmp.ne.s32.totalorder %s2789_s22, %s2427_s18  ;;  %p2432_p1 = scmp.lt.u32.totalorder %s2789_s22, %s2844_s7 }
 0x3e3   : > { %p2433_p3 = scmp.lt.u32.totalorder %s2431_s20, %s2427_s18  ;;  %p2435_p11 = scmp.lt.u32.totalorder %s2427_s18, %s2789_s22 }
 0x3e4   : > { %p2429_p9 = pnand %p2428_p8, %p1959_p6 }
 0x3e5   : > { %p2434_p5 = por %p2433_p3, %p2432_p1 }
 0x3e6   : > { %p2430_p10 = pneg %p2429_p9 }
 0x3e7   : > { %p2436_p13 = por %p2435_p11, %p2434_p5 }
 0x3e9   : > { %p2437_p0 = pnand %p2436_p13, %p2430_p10 }
 0x3eb   : > { %2440 = shalt.err (!%p2437_p0)
}
 0x3ec   : > { %s2502_s10 = smov 64   ;;  %s2503_s8 = smov 4  }
 0x3ed   : > { %1690 = dma.vmem_to_hbm [thread:$0]  (%p1959_p6), %s2791_s29, %s2779_s14, %s2789_s22, %s1665_s30, %s2502_s10, %s2502_s10, %s2503_s8  }
 0x3ee PF: > { %s2873_s16 = sld [smem:[#allocation15_spill]]  ;;  %s2874_s11 = sld [smem:[#allocation18_spill]] }
 0x3f4   : > { %s1699_s13 = sand.u32 1, %s2873_s16   ;;  %p2875_p12 = scmp.ne.s32.totalorder %s2874_s11, 0 }
 0x3f5   : > { %s1700_s21 = scalar_lea.sflag [#allocation4], %s1699_s13 }
 0x3f6   : > { %p2035_p7 = pnand %p1791_p4, %p2875_p12 }
 0x3f8   : > { %2470 = dma.done.wait (!%p2035_p7), %s1700_s21, 128  }
 0x3f9   : > { %2472 = vsyncadd (!%p2035_p7), %s1700_s21, 4294967168  ;;  %s2876_s27 = sld [smem:[#allocation16_spill]]  ;;  %s2877_s12 = sld [smem:[#allocation17_spill]] }
 0x3fa   : > { %s2878_s24 = smov %s2479_s25  ;;  %s2879_s25 = smov %s2483_s26 }
 0x3ff   : > { %p22_p2 = scmp.ge.s32.totalorder %s2876_s27, 4   ;;  %s2880_s26 = smov %s2877_s12 }
 0x401   :  { %24 = sbr.rel (!%p22_p2) target bundleno = 9 (0x9), region = 105 }
 0x408   :  { %1705 = vsyncpa [#allocation3], 1 }
 0x409   :  { %1707 = vsyncpa [#allocation3 + $0x1], 1 }
 0x40a   :  { %1708 = vsyncpa [#allocation6], 1 }
 0x40b   :  { %1709 = vsyncpa [#allocation9], 1 }
 0x40c   :  { %1710 = vsyncpa [#allocation4], 1 }
 0x40d   :  { %1712 = vsyncpa [#allocation4 + $0x1], 1 }

</bundles_post_ra>
